<compile_context>
chip_gen: v6e
topology: v6e:2x2x1
jax: 0.10.0
libtpu: 0.0.40
codegen_flags: <defaults>
</compile_context>

<pallas_src>
import functools

import jax
import jax.numpy as jnp
from jax.experimental import pallas as pl
from jax.experimental.pallas import tpu as pltpu


def _round_up(x: int, m: int) -> int:
    return (x + m - 1) // m * m


def make_infonce_kernel(tm: int, tn: int, batch: int, b_pad: int,
                        temperature: float, dot_dtype):
    inv_t = 1.0 / float(temperature)

    def _l2norm(x):
        # F.normalize(x, dim=1) with eps=1e-12:  x / max(||x||, 1e-12)
        # == x * rsqrt(max(||x||^2, 1e-24))   (sqrt is monotone)
        xf = x.astype(jnp.float32)
        ss = jnp.sum(xf * xf, axis=1, keepdims=True)
        return xf * jax.lax.rsqrt(jnp.maximum(ss, 1e-24))

    def kernel(a_row_ref, a_col_ref, p_col_ref, lab_row_ref, lab_col_ref,
               out_ref, pos_acc, den_acc):
        i = pl.program_id(0)           # row tile
        j = pl.program_id(1)           # column tile (reduction axis)
        nj = pl.num_programs(1)

        @pl.when(j == 0)
        def _init():
            pos_acc[...] = jnp.zeros_like(pos_acc)
            den_acc[...] = jnp.zeros_like(den_acc)

        # ---- normalize (rsqrt); fold 1/T into the query side -------------
        a_q = (_l2norm(a_row_ref[...]) * inv_t).astype(dot_dtype)   # (tm, D)
        a_k = _l2norm(a_col_ref[...]).astype(dot_dtype)             # (tn, D)
        p_k = _l2norm(p_col_ref[...]).astype(dot_dtype)             # (tn, D)

        # ---- two B x B halves instead of one B x 2B matmul ---------------
        dn = (((1,), (1,)), ((), ()))
        sim_a = jax.lax.dot_general(a_q, a_k, dn,
                                    preferred_element_type=jnp.float32)
        sim_p = jax.lax.dot_general(a_q, p_k, dn,
                                    preferred_element_type=jnp.float32)

        # exp of both halves; they share all masks below.
        esum = jnp.exp(sim_a) + jnp.exp(sim_p)                       # (tm, tn)

        # ---- masks from a single iota pair --------------------------------
        row_ids = i * tm + jax.lax.broadcasted_iota(jnp.int32, (tm, tn), 0)
        col_ids = j * tn + jax.lax.broadcasted_iota(jnp.int32, (tm, tn), 1)
        keep = row_ids != col_ids          # drops (i, i) and (i, B+i)
        if batch < b_pad:
            keep = keep & (col_ids < batch)   # drop padded columns
        lab_eq = lab_col_ref[...] == lab_row_ref[...]                # (tm, tn)

        # ---- fused selects + running reductions ---------------------------
        e_keep = jnp.where(keep, esum, 0.0)
        den_acc[...] += jnp.sum(e_keep, axis=1, keepdims=True)
        pos_acc[...] += jnp.sum(jnp.where(lab_eq, e_keep, 0.0),
                                axis=1, keepdims=True)

        @pl.when(j == nj - 1)
        def _finalize():
            eps = 1e-8
            out_ref[...] = -jnp.log((pos_acc[...] + eps) /
                                    (den_acc[...] + eps))

    return kernel


def infonce_loss(anchors, positives, labels, temperature,
                 *, block_rows: int = 128, block_cols: int = 256):
    """anchors/positives: [B, D] (f32 or bf16), labels: [B] int -> scalar f32."""
    B, D = anchors.shape

    # ---- tile selection ----------------------------------------------------
    if B <= block_cols:
        b_pad = _round_up(max(B, 8), 8)
        tm = tn = b_pad                      # single tile in each grid dim
    else:
        assert block_cols % 128 == 0 and block_rows % 8 == 0
        assert block_cols % block_rows == 0
        tn = block_cols
        tm = block_rows
        b_pad = _round_up(B, tn)

    pad = b_pad - B
    if pad:
        anchors = jnp.pad(anchors, ((0, pad), (0, 0)))
        positives = jnp.pad(positives, ((0, pad), (0, 0)))
        labels = jnp.pad(labels, ((0, pad),))

    labels_row = labels.reshape(1, b_pad).astype(jnp.int32)
    labels_col = labels.reshape(b_pad, 1).astype(jnp.int32)

    # bf16 inputs drive the MXU in bf16 (f32 accumulation); f32 stays f32.
    dot_dtype = jnp.bfloat16 if anchors.dtype == jnp.bfloat16 else jnp.float32

    grid = (b_pad // tm, b_pad // tn)
    kernel = make_infonce_kernel(tm, tn, B, b_pad, float(temperature),
                                 dot_dtype)

    losses = pl.pallas_call(
        kernel,
        out_shape=jax.ShapeDtypeStruct((b_pad, 1), jnp.float32),
        grid_spec=pltpu.PrefetchScalarGridSpec(
            num_scalar_prefetch=0,
            grid=grid,
            in_specs=[
                pl.BlockSpec((tm, D), lambda i, j: (i, 0)),   # anchor row tile
                pl.BlockSpec((tn, D), lambda i, j: (j, 0)),   # anchor col tile
                pl.BlockSpec((tn, D), lambda i, j: (j, 0)),   # positive col tile
                pl.BlockSpec((1, tn), lambda i, j: (0, j)),   # labels (row vec)
                pl.BlockSpec((tm, 1), lambda i, j: (i, 0)),   # labels (col vec)
            ],
            out_specs=pl.BlockSpec((tm, 1), lambda i, j: (i, 0)),
            scratch_shapes=[
                pltpu.VMEM((tm, 1), jnp.float32),   # positive-sum accumulator
                pltpu.VMEM((tm, 1), jnp.float32),   # denominator accumulator
            ],
        ),
        compiler_params=pltpu.CompilerParams(
            dimension_semantics=("parallel", "arbitrary"),
            vmem_limit_bytes=32 * 1024 * 1024,
        ),
    )(anchors, anchors, positives, labels_row, labels_col)

    # Tiny epilogue: mean over the B real rows (padded rows dropped).
    return jnp.mean(losses[:B, 0])


def infonce_loss_ref(anchors, positives, labels, temperature):
    """Pure-JAX reference mirroring the PyTorch module."""
    def norm(x):
        n = jnp.sqrt(jnp.sum(x * x, axis=1, keepdims=True))
        return x / jnp.maximum(n, 1e-12)

    a = norm(anchors.astype(jnp.float32))
    p = norm(positives.astype(jnp.float32))
    all_emb = jnp.concatenate([a, p], axis=0)
    sim = jnp.matmul(a, all_emb.T,
                     precision=jax.lax.Precision.HIGHEST) / temperature
    B = a.shape[0]
    lab_eq = labels[:, None] == labels[None, :]
    labels_mat = jnp.concatenate([lab_eq, lab_eq], axis=1)
    labels_mat = labels_mat & ~jnp.pad(jnp.eye(B, dtype=bool), ((0, 0), (0, B)))
    full_mask = jnp.concatenate([jnp.eye(B, dtype=bool)] * 2, axis=1)
    exp_sim = jnp.where(full_mask, 0.0, jnp.exp(sim))
    pos = jnp.sum(exp_sim * labels_mat.astype(jnp.float32), axis=1)
    denom = jnp.sum(exp_sim, axis=1)
    eps = 1e-8
    return jnp.mean(-jnp.log((pos + eps) / (denom + eps)))


if __name__ == "__main__":
    temperature = 0.1

    # --- small single-tile case ---------------------------------------------
    key = jax.random.PRNGKey(0)
    k1, k2, k3 = jax.random.split(key, 3)
    B, D = 8, 32
    anchors = jax.random.normal(k1, (B, D), dtype=jnp.float32)
    positives = jax.random.normal(k2, (B, D), dtype=jnp.float32)
    labels = jax.random.randint(k3, (B,), 0, 4, dtype=jnp.int32)

    loss = infonce_loss(anchors, positives, labels, temperature)
    jax.block_until_ready(loss)
    ref = infonce_loss_ref(anchors, positives, labels, temperature)
    assert jnp.allclose(loss, ref, rtol=1e-3, atol=1e-5), (loss, ref)

    # --- multi-tile case: exercises row-parallel x column-reduction grid,
    #     accumulators and batch padding/masking (B=200 -> padded 256, 2x2 grid)
    k4, k5, k6 = jax.random.split(jax.random.PRNGKey(1), 3)
    B2, D2 = 200, 64
    a2 = jax.random.normal(k4, (B2, D2), dtype=jnp.float32)
    p2 = jax.random.normal(k5, (B2, D2), dtype=jnp.float32)
    l2 = jax.random.randint(k6, (B2,), 0, 16, dtype=jnp.int32)

    loss2 = infonce_loss(a2, p2, l2, temperature,
                         block_rows=128, block_cols=128)
    jax.block_until_ready(loss2)
    ref2 = infonce_loss_ref(a2, p2, l2, temperature)
    assert jnp.allclose(loss2, ref2, rtol=1e-3, atol=1e-5), (loss2, ref2)

    print("KERNEL_OK")
</pallas_src>

<mosaic_0001>
module attributes {stable_mosaic.version = 11 : i64} {
  func.func @kernel(%arg0: i32, %arg1: i32, %arg2: memref<8x32xf32, #tpu.memory_space<vmem>>, %arg3: memref<8x32xf32, #tpu.memory_space<vmem>>, %arg4: memref<8x32xf32, #tpu.memory_space<vmem>>, %arg5: memref<1x8xi32, #tpu.memory_space<vmem>>, %arg6: memref<8x1xi32, #tpu.memory_space<vmem>>, %arg7: memref<8x1xf32, #tpu.memory_space<vmem>>, %arg8: memref<8x1xf32, #tpu.memory_space<vmem>>, %arg9: memref<8x1xf32, #tpu.memory_space<vmem>>) attributes {dimension_semantics = [#tpu.dimension_semantics<parallel>, #tpu.dimension_semantics<arbitrary>], iteration_bounds = array<i64: 1, 1>, scalar_prefetch = 0 : i64, scratch_operands = 2 : i64, tpu.core_type = #tpu.core_type<tc>, window_params = [{transform_indices = @transform_0, window_bounds = array<i64: 8, 32>}, {transform_indices = @transform_1, window_bounds = array<i64: 8, 32>}, {transform_indices = @transform_2, window_bounds = array<i64: 8, 32>}, {transform_indices = @transform_3, window_bounds = array<i64: 1, 8>}, {transform_indices = @transform_4, window_bounds = array<i64: 8, 1>}, {transform_indices = @transform_5, window_bounds = array<i64: 8, 1>}]} {
    %c0_i32 = arith.constant 0 : i32
    %0 = arith.cmpi eq, %arg1, %c0_i32 : i32
    %1 = arith.extui %0 : i1 to i32
    %c0_i32_0 = arith.constant 0 : i32
    %2 = arith.cmpi ne, %1, %c0_i32_0 : i32
    scf.if %2 {
      %cst_33 = arith.constant 0.000000e+00 : f32
      %68 = vector.broadcast %cst_33 : f32 to vector<8x1xf32>
      %c0_34 = arith.constant 0 : index
      %c0_35 = arith.constant 0 : index
      %69 = vector.load %arg8[%c0_34, %c0_35] : memref<8x1xf32, #tpu.memory_space<vmem>>, vector<8x1xf32>
      tpu.vector_store %arg8[%c0_34, %c0_35], %68 {strides = array<i32>} : memref<8x1xf32, #tpu.memory_space<vmem>>, vector<8x1xf32>,
      %cst_36 = arith.constant 0.000000e+00 : f32
      %70 = vector.broadcast %cst_36 : f32 to vector<8x1xf32>
      %c0_37 = arith.constant 0 : index
      %c0_38 = arith.constant 0 : index
      %71 = vector.load %arg9[%c0_37, %c0_38] : memref<8x1xf32, #tpu.memory_space<vmem>>, vector<8x1xf32>
      tpu.vector_store %arg9[%c0_37, %c0_38], %70 {strides = array<i32>} : memref<8x1xf32, #tpu.memory_space<vmem>>, vector<8x1xf32>,
    } else {
    }
    %c0 = arith.constant 0 : index
    %c0_1 = arith.constant 0 : index
    %3 = vector.load %arg2[%c0, %c0_1] : memref<8x32xf32, #tpu.memory_space<vmem>>, vector<8x32xf32>
    %4 = arith.mulf %3, %3 : vector<8x32xf32>
    %cst = arith.constant dense<0.000000e+00> : vector<8xf32>
    %5 = vector.multi_reduction <add>, %4, %cst [1] : vector<8x32xf32> to vector<8xf32>
    %6 = vector.shape_cast %5 : vector<8xf32> to vector<8x1xf32>
    %cst_2 = arith.constant 1.000000e-24 : f32
    %7 = vector.broadcast %cst_2 : f32 to vector<8x1xf32>
    %8 = arith.maximumf %6, %7 : vector<8x1xf32>
    %9 = math.rsqrt %8 : vector<8x1xf32>
    %10 = vector.broadcast %9 : vector<8x1xf32> to vector<8x32xf32>
    %11 = arith.mulf %3, %10 : vector<8x32xf32>
    %cst_3 = arith.constant 1.000000e+01 : f32
    %12 = vector.broadcast %cst_3 : f32 to vector<8x32xf32>
    %13 = arith.mulf %11, %12 : vector<8x32xf32>
    %c0_4 = arith.constant 0 : index
    %c0_5 = arith.constant 0 : index
    %14 = vector.load %arg3[%c0_4, %c0_5] : memref<8x32xf32, #tpu.memory_space<vmem>>, vector<8x32xf32>
    %15 = arith.mulf %14, %14 : vector<8x32xf32>
    %cst_6 = arith.constant dense<0.000000e+00> : vector<8xf32>
    %16 = vector.multi_reduction <add>, %15, %cst_6 [1] : vector<8x32xf32> to vector<8xf32>
    %17 = vector.shape_cast %16 : vector<8xf32> to vector<8x1xf32>
    %cst_7 = arith.constant 1.000000e-24 : f32
    %18 = vector.broadcast %cst_7 : f32 to vector<8x1xf32>
    %19 = arith.maximumf %17, %18 : vector<8x1xf32>
    %20 = math.rsqrt %19 : vector<8x1xf32>
    %21 = vector.broadcast %20 : vector<8x1xf32> to vector<8x32xf32>
    %22 = arith.mulf %14, %21 : vector<8x32xf32>
    %c0_8 = arith.constant 0 : index
    %c0_9 = arith.constant 0 : index
    %23 = vector.load %arg4[%c0_8, %c0_9] : memref<8x32xf32, #tpu.memory_space<vmem>>, vector<8x32xf32>
    %24 = arith.mulf %23, %23 : vector<8x32xf32>
    %cst_10 = arith.constant dense<0.000000e+00> : vector<8xf32>
    %25 = vector.multi_reduction <add>, %24, %cst_10 [1] : vector<8x32xf32> to vector<8xf32>
    %26 = vector.shape_cast %25 : vector<8xf32> to vector<8x1xf32>
    %cst_11 = arith.constant 1.000000e-24 : f32
    %27 = vector.broadcast %cst_11 : f32 to vector<8x1xf32>
    %28 = arith.maximumf %26, %27 : vector<8x1xf32>
    %29 = math.rsqrt %28 : vector<8x1xf32>
    %30 = vector.broadcast %29 : vector<8x1xf32> to vector<8x32xf32>
    %31 = arith.mulf %23, %30 : vector<8x32xf32>
    %cst_12 = arith.constant dense<0.000000e+00> : vector<8x8xf32>
    %32 = tpu.matmul %13, %22, %cst_12 {dimension_numbers = #tpu.dot_dimension_numbers<[1], [1], [0], [0], [0, 0, 1, 0], [], []>} : vector<8x32xf32>, vector<8x32xf32>, vector<8x8xf32> -> vector<8x8xf32>
    %cst_13 = arith.constant dense<0.000000e+00> : vector<8x8xf32>
    %33 = tpu.matmul %13, %31, %cst_13 {dimension_numbers = #tpu.dot_dimension_numbers<[1], [1], [0], [0], [0, 0, 1, 0], [], []>} : vector<8x32xf32>, vector<8x32xf32>, vector<8x8xf32> -> vector<8x8xf32>
    %34 = math.exp %32 : vector<8x8xf32>
    %35 = math.exp %33 : vector<8x8xf32>
    %36 = arith.addf %34, %35 : vector<8x8xf32>
    %c8_i32 = arith.constant 8 : i32
    %37 = arith.muli %arg0, %c8_i32 : i32
    %38 = tpu.iota {dimensions = array<i32: 0>} : vector<8x8xi32>
    %39 = vector.broadcast %37 : i32 to vector<8x8xi32>
    %40 = arith.addi %39, %38 : vector<8x8xi32>
    %c8_i32_14 = arith.constant 8 : i32
    %41 = arith.muli %arg1, %c8_i32_14 : i32
    %42 = tpu.iota {dimensions = array<i32: 1>} : vector<8x8xi32>
    %43 = vector.broadcast %41 : i32 to vector<8x8xi32>
    %44 = arith.addi %43, %42 : vector<8x8xi32>
    %45 = arith.cmpi ne, %40, %44 : vector<8x8xi32>
    %c0_15 = arith.constant 0 : index
    %c0_16 = arith.constant 0 : index
    %46 = vector.load %arg6[%c0_15, %c0_16] : memref<8x1xi32, #tpu.memory_space<vmem>>, vector<8x1xi32>
    %c0_17 = arith.constant 0 : index
    %c0_18 = arith.constant 0 : index
    %47 = vector.load %arg5[%c0_17, %c0_18] : memref<1x8xi32, #tpu.memory_space<vmem>>, vector<1x8xi32>
    %48 = vector.broadcast %46 : vector<8x1xi32> to vector<8x8xi32>
    %49 = vector.broadcast %47 : vector<1x8xi32> to vector<8x8xi32>
    %50 = arith.cmpi eq, %48, %49 : vector<8x8xi32>
    %cst_19 = arith.constant 0.000000e+00 : f32
    %51 = vector.broadcast %cst_19 : f32 to vector<8x8xf32>
    %52 = arith.select %45, %36, %51 : vector<8x8xi1>, vector<8x8xf32>
    %c0_20 = arith.constant 0 : index
    %c0_21 = arith.constant 0 : index
    %53 = vector.load %arg9[%c0_20, %c0_21] : memref<8x1xf32, #tpu.memory_space<vmem>>, vector<8x1xf32>
    %cst_22 = arith.constant dense<0.000000e+00> : vector<8xf32>
    %54 = vector.multi_reduction <add>, %52, %cst_22 [1] : vector<8x8xf32> to vector<8xf32>
    %55 = vector.shape_cast %54 : vector<8xf32> to vector<8x1xf32>
    %56 = arith.addf %53, %55 : vector<8x1xf32>
    %c0_23 = arith.constant 0 : index
    %c0_24 = arith.constant 0 : index
    %57 = vector.load %arg9[%c0_23, %c0_24] : memref<8x1xf32, #tpu.memory_space<vmem>>, vector<8x1xf32>
    tpu.vector_store %arg9[%c0_23, %c0_24], %56 {strides = array<i32>} : memref<8x1xf32, #tpu.memory_space<vmem>>, vector<8x1xf32>,
    %c0_25 = arith.constant 0 : index
    %c0_26 = arith.constant 0 : index
    %58 = vector.load %arg8[%c0_25, %c0_26] : memref<8x1xf32, #tpu.memory_space<vmem>>, vector<8x1xf32>
    %cst_27 = arith.constant 0.000000e+00 : f32
    %59 = vector.broadcast %cst_27 : f32 to vector<8x8xf32>
    %60 = arith.select %50, %52, %59 : vector<8x8xi1>, vector<8x8xf32>
    %cst_28 = arith.constant dense<0.000000e+00> : vector<8xf32>
    %61 = vector.multi_reduction <add>, %60, %cst_28 [1] : vector<8x8xf32> to vector<8xf32>
    %62 = vector.shape_cast %61 : vector<8xf32> to vector<8x1xf32>
    %63 = arith.addf %58, %62 : vector<8x1xf32>
    %c0_29 = arith.constant 0 : index
    %c0_30 = arith.constant 0 : index
    %64 = vector.load %arg8[%c0_29, %c0_30] : memref<8x1xf32, #tpu.memory_space<vmem>>, vector<8x1xf32>
    tpu.vector_store %arg8[%c0_29, %c0_30], %63 {strides = array<i32>} : memref<8x1xf32, #tpu.memory_space<vmem>>, vector<8x1xf32>,
    %c0_i32_31 = arith.constant 0 : i32
    %65 = arith.cmpi eq, %arg1, %c0_i32_31 : i32
    %66 = arith.extui %65 : i1 to i32
    %c0_i32_32 = arith.constant 0 : i32
    %67 = arith.cmpi ne, %66, %c0_i32_32 : i32
    scf.if %67 {
      %c0_33 = arith.constant 0 : index
      %c0_34 = arith.constant 0 : index
      %68 = vector.load %arg8[%c0_33, %c0_34] : memref<8x1xf32, #tpu.memory_space<vmem>>, vector<8x1xf32>
      %cst_35 = arith.constant 9.99999993E-9 : f32
      %69 = vector.broadcast %cst_35 : f32 to vector<8x1xf32>
      %70 = arith.addf %68, %69 : vector<8x1xf32>
      %c0_36 = arith.constant 0 : index
      %c0_37 = arith.constant 0 : index
      %71 = vector.load %arg9[%c0_36, %c0_37] : memref<8x1xf32, #tpu.memory_space<vmem>>, vector<8x1xf32>
      %cst_38 = arith.constant 9.99999993E-9 : f32
      %72 = vector.broadcast %cst_38 : f32 to vector<8x1xf32>
      %73 = arith.addf %71, %72 : vector<8x1xf32>
      %74 = arith.divf %70, %73 : vector<8x1xf32>
      %75 = math.log %74 : vector<8x1xf32>
      %cst_39 = arith.constant 0.000000e+00 : f32
      %76 = vector.broadcast %cst_39 : f32 to vector<8x1xf32>
      %77 = arith.subf %76, %75 : vector<8x1xf32>
      %c0_40 = arith.constant 0 : index
      %c0_41 = arith.constant 0 : index
      %78 = vector.load %arg7[%c0_40, %c0_41] : memref<8x1xf32, #tpu.memory_space<vmem>>, vector<8x1xf32>
      tpu.vector_store %arg7[%c0_40, %c0_41], %77 {strides = array<i32>} : memref<8x1xf32, #tpu.memory_space<vmem>>, vector<8x1xf32>,
    } else {
    }
    return
  }
  func.func @transform_0(%arg0: i32, %arg1: i32) -> (i32, i32) {
    %c0_i32 = arith.constant 0 : i32
    %c0_i32_0 = arith.constant 0 : i32
    return %arg0, %c0_i32 : i32, i32
  }
  func.func @transform_1(%arg0: i32, %arg1: i32) -> (i32, i32) {
    %c0_i32 = arith.constant 0 : i32
    %c0_i32_0 = arith.constant 0 : i32
    return %arg1, %c0_i32 : i32, i32
  }
  func.func @transform_2(%arg0: i32, %arg1: i32) -> (i32, i32) {
    %c0_i32 = arith.constant 0 : i32
    %c0_i32_0 = arith.constant 0 : i32
    return %arg1, %c0_i32 : i32, i32
  }
  func.func @transform_3(%arg0: i32, %arg1: i32) -> (i32, i32) {
    %c0_i32 = arith.constant 0 : i32
    %c0_i32_0 = arith.constant 0 : i32
    return %c0_i32, %arg1 : i32, i32
  }
  func.func @transform_4(%arg0: i32, %arg1: i32) -> (i32, i32) {
    %c0_i32 = arith.constant 0 : i32
    %c0_i32_0 = arith.constant 0 : i32
    return %arg0, %c0_i32 : i32, i32
  }
  func.func @transform_5(%arg0: i32, %arg1: i32) -> (i32, i32) {
    %c0_i32 = arith.constant 0 : i32
    %c0_i32_0 = arith.constant 0 : i32
    return %arg0, %c0_i32 : i32, i32
  }
}

</mosaic_0001>

<bundles_post_ra>
// kernel: tpu_custom_call.1
= control target key start
LH: loop header
LB: loop body
LE: loop exit
PB: predicated region body
PF: predicated region fallthrough
CT: control target
= control target key end

     0   :  { %10 = vsyncpa [#allocation5], 0  ;;  %s436_s0 = inlined_call_operand.vmem [shape: f32[8,32], index: 0, kind: input, shape index: {}]   ;;  %s437_s1 = inlined_call_operand.hbm [shape: f32[8,32], index: 1, kind: input, shape index: {}]   ;;  %s438_s2 = inlined_call_operand.hbm [shape: f32[8,32], index: 2, kind: input, shape index: {}]   ;;  %s439_s3 = inlined_call_operand.vmem [shape: s32[1,8], index: 3, kind: input, shape index: {}]   ;;  %s440_s4 = inlined_call_operand.vmem [shape: s32[8,1], index: 4, kind: input, shape index: {}]   ;;  %s441_s5 = inlined_call_operand.vmem [shape: f32[8,1], index: 5, kind: output, shape index: {}]  }
   0x1   :  { %11 = vsyncpa [#allocation7], 0  ;;  %s371_s18 = smov [#allocation4]   ;;  %s372_s20 = smov [#allocation6]  }
   0x2   :  { %s20_s19 = sshll.u32 %s371_s18, 4  ;;  %s30_s21 = sshll.u32 %s372_s20, 4  ;;  %s21_s19 = int_to_ptr.vmem [resolvable:$true] %s20_s19  ;;  %s31_s21 = int_to_ptr.vmem [resolvable:$true] %s30_s21 }
   0x3   :  { %s335_s22 = scalar_lea.vmem %s21_s19, 128  ;;  %p340_p1 = scmp.lt.s32.totalorder %s21_s19, %s21_s19 }
   0x4   :  { %p336_p0 = scmp.ne.s32.totalorder %s21_s19, %s335_s22  ;;  %p341_p2 = scmp.lt.s32.totalorder %s335_s22, %s335_s22 }
   0x6   :  { %p342_p3 = por %p341_p2, %p340_p1 }
   0x8   :  { %p343_p4 = pnand %p342_p3, %p336_p0 }
   0xa   :  { %346 = shalt.err (!%p343_p4)
}
   0xb   :  { %23 = dma.hbm_to_vmem [thread:$0]  %s437_s1, 128, %s21_s19, [#allocation5]  }
   0xc   :  { %s355_s25 = scalar_lea.vmem %s31_s21, 128  ;;  %p360_p6 = scmp.lt.s32.totalorder %s31_s21, %s31_s21 }
   0xd   :  { %p356_p5 = scmp.ne.s32.totalorder %s31_s21, %s355_s25  ;;  %p361_p7 = scmp.lt.s32.totalorder %s355_s25, %s355_s25 }
   0xf   :  { %p362_p8 = por %p361_p7, %p360_p6 }
  0x11   :  { %p363_p9 = pnand %p362_p8, %p356_p5 }
  0x13   :  { %366 = shalt.err (!%p363_p9)
}
  0x14   :  { %33 = dma.hbm_to_vmem [thread:$0]  %s438_s2, 128, %s31_s21, [#allocation7]  }
  0x15   :  { %367 = dma.done.wait [#allocation5], 128  }
  0x16   :  { %368 = vsyncadd [#allocation5], 4294967168 }
  0x17   :  { %369 = dma.done.wait [#allocation7], 128  }
  0x18   :  { %370 = vsyncadd [#allocation7], 4294967168  ;;  %vm53_vm0 = vcmask 261120   ;;  %v61_v0 = vld [vmem:[#allocation4] sm:$0xff]  ;;  %v51_v1 = vld [vmem:[%s436_s0] sm:$0xff]  ;;  %v373_v9 = vmov 0.0   ;;  %v232_v31 = vlaneseq }
  0x19   :  { %v69_v2 = vld [vmem:[#allocation6] sm:$0xff]  ;;  %v62_v3 = vmul.f32 %v61_v0, %v61_v0  ;;  %v52_v4 = vmul.f32 %v51_v1, %v51_v1  ;;  %296 = vmatprep.subr.mxu0 %v373_v9  ;;  %301 = vmatprep.subr.mxu1 %v373_v9  ;;  %vm374_vm1 = vmmov 0   ;;  %v242_v10 = vld [vmem:[%s440_s4] sm:$0xff]  ;;  %v375_v11 = vmov 0  }
  0x1a   :  { %v70_v5 = vmul.f32 %v69_v2, %v69_v2  ;;  %298 = vmatprep.mubr.msk.f32.mxu0 %vm374_vm1, %v373_v9  ;;  %303 = vmatprep.mubr.msk.f32.mxu1 %vm374_vm1, %v373_v9  ;;  %vm48_vm2 = vcmask 7168   ;;  %v233_v32 = vshrl.u32 %v232_v31, 7  ;;  %v238_v33 = vand.u32 127, %v232_v31  ;;  %v291_v35 = vld [vmem:[%s439_s3] ss:$0 sm:$0xff] }
  0x1b   :  { %v63_v6 = vsel %vm53_vm0, %v62_v3, 0.0  ;;  %v54_v7 = vsel %vm53_vm0, %v52_v4, 0.0  ;;  %311 = vset.pattern.permute.xlu1 %v375_v11  ;;  %312 = vset.pattern.permute.xlu0 %v375_v11  ;;  %50 = vst.msk [vmem:[#allocation3] sm:$0xff] %vm48_vm2, %v373_v9  ;;  %49 = vst.msk [vmem:[#allocation2] sm:$0xff] %vm48_vm2, %v373_v9  ;;  %vm254_vm4 = vcmask 64512  }
  0x1c   :  { %64 = vadd.xlane.f32.xlu0 %v63_v6  ;;  %55 = vadd.xlane.f32.xlu1 %v54_v7  ;;  %v71_v8 = vsel %vm53_vm0, %v70_v5, 0.0  ;;  %vm241_vm3 = vcmp.ne.s32.totalorder %v233_v32, %v238_v33 }
  0x20   :  { %72 = vadd.xlane.f32.xlu0 %v71_v8 }
  0x22   :  { %v253_v43 = vld [vmem:[#allocation3] sm:$0xff]  ;;  %v261_v46 = vld [vmem:[#allocation2] sm:$0xff] }
  0x2d   :  { %245 = vperm.xlu1 %311, %v242_v10  }
  0xa5   :  { %v65_v12 = vpop.xlane.xlu0 %64  ;;  %v56_v13 = vpop.xlane.xlu1 %55 }
  0xa6   :  { %v66_v14 = vmax.f32 %v65_v12, 1e-24  ;;  %v57_v15 = vmax.f32 %v56_v13, 1e-24 }
  0xa8   :  { %313 = vrsqrt.f32 %v66_v14 }
  0xa9   :  { %315 = vrsqrt.f32 %v57_v15  ;;  %v73_v16 = vpop.xlane.xlu0 %72  ;;  %v246_v36 = vpop.permute.xlu1 %245 }
  0xaa   :  { %v74_v17 = vmax.f32 %v73_v16, 1e-24  ;;  %vm251_vm5 = vcmp.eq.s32.totalorder %v246_v36, %v291_v35 }
  0xac   :  { %317 = vrsqrt.f32 %v74_v17 }
  0xb5   :  { %v314_v18 = vpop.eup %313 }
  0xb6   :  { %v316_v19 = vpop.eup %315  ;;  %v68_v20 = vmul.f32 %v314_v18, %v61_v0 }
  0xb7   :  { %v59_v21 = vmul.f32 %v316_v19, %v51_v1 }
  0xb8   :  { %297 = vmatpush3.xpose.msk.msra.mxu0 %vm53_vm0, %v68_v20 }
  0xb9   :  { %v318_v22 = vpop.eup %317  ;;  %v60_v23 = vmul.f32 10.0, %v59_v21 }
  0xba   :  { %v76_v24 = vmul.f32 %v318_v22, %v69_v2 }
  0xbb   :  { %299 = vmatmul.mubr.msk.f32.vlgmr.msra.gmra.mxu0 %vm53_vm0, %v60_v23 }
  0xbc   :  { %302 = vmatpush3.xpose.msk.msra.mxu1 %vm53_vm0, %v76_v24 }
  0xbf   :  { %304 = vmatmul.mubr.msk.f32.vlgmr.msra.gmra.mxu1 %vm53_vm0, %v60_v23 }
 0x17b   :  { %v149_v25 = vpop.f32.mrf.mxu0 }
 0x17c   :  { %v226_v26 = vmul.f32 1.442695, %v149_v25 }
 0x17d   :  { %v300_v27 = vpop.f32.mrf.mxu0 }
 0x17e   :  { %319 = vpow2.f32 %v226_v26 }
 0x17f   :  { %v222_v28 = vpop.f32.mrf.mxu1 }
 0x180   :  { %v228_v29 = vmul.f32 1.442695, %v222_v28 }
 0x181   :  { %v305_v30 = vpop.f32.mrf.mxu1 }
 0x182   :  { %321 = vpow2.f32 %v228_v29 }
 0x18b   :  { %v320_v34 = vpop.eup %319 }
 0x18f   :  { %v322_v37 = vpop.eup %321 }
 0x190   :  { %v230_v38 = vadd.f32 %v322_v37, %v320_v34 }
 0x192   :  { %v252_v39 = vsel %vm241_vm3, %v230_v38, 0.0 }
 0x193   :  { %v255_v40 = vsel %vm254_vm4, %v252_v39, 0.0  ;;  %v262_v41 = vsel %vm251_vm5, %v252_v39, 0.0 }
 0x194   :  { %256 = vadd.xlane.f32.xlu0 %v255_v40  ;;  %v263_v42 = vsel %vm254_vm4, %v262_v41, 0.0 }
 0x198   :  { %264 = vadd.xlane.f32.xlu0 %v263_v42 }
 0x21d   :  { %v257_v44 = vpop.xlane.xlu0 %256 }
 0x21e   :  { %v258_v45 = vadd.f32 %v257_v44, %v253_v43 }
 0x220   :  { %260 = vst.msk [vmem:[#allocation3] sm:$0xff] %vm48_vm2, %v258_v45 }
 0x221   :  { %v265_v47 = vpop.xlane.xlu0 %264 }
 0x222   :  { %v266_v48 = vadd.f32 %v265_v47, %v261_v46 }
 0x224   :  { %267 = vst.msk [vmem:[#allocation2] sm:$0xff] %vm48_vm2, %v266_v48 }
 0x227   :  { %v273_v49 = vld [vmem:[#allocation3] sm:$0xff] }
 0x228   :  { %v274_v50 = vadd.f32 1e-08, %v273_v49 }
 0x22a   :  { %323 = vrcp.f32 %v274_v50 }
 0x22b   :  { %v271_v51 = vld [vmem:[#allocation2] sm:$0xff] }
 0x22c   :  { %v272_v52 = vadd.f32 1e-08, %v271_v51 }
 0x237   :  { %v324_v53 = vpop.eup %323 }
 0x238   :  { %v276_v54 = vmul.f32 %v324_v53, %v272_v52 }
 0x23a   :  { %325 = vlog2.f32 %v276_v54 }
 0x247   :  { %v326_v55 = vpop.eup %325 }
 0x248   :  { %v278_v56 = vmul.f32 0.6931472, %v326_v55 }
 0x24a   :  { %v279_v57 = vsub.f32 0.0, %v278_v56 }
 0x24c   :  { %280 = vst.msk [vmem:[%s441_s5] sm:$0xff] %vm48_vm2, %v279_v57 }
 0x24d   :  { %285 = vsyncpa [#allocation5], 1 }
 0x24e   :  { %286 = vsyncpa [#allocation7], 1 }

</bundles_post_ra>
